<compile_context>
chip_gen: v6e
topology: v6e:2x2x1
jax: 0.10.0
libtpu: 0.0.40
codegen_flags: <defaults>
</compile_context>

<pallas_src>
import functools
import math

import jax
import jax.numpy as jnp
from jax.experimental import pallas as pl
from jax.experimental.pallas import tpu as pltpu


# ---------------------------------------------------------------------------
# Kernel
# ---------------------------------------------------------------------------
def _bayes_linear_kernel(*refs, tk, nk, sigma_prior, x_sliced,
                         sample_eps, emit_samples):
    """Grid = (Out/tn, In/tk); k (reduction over In) is the LAST axis.

    Resident output blocks (index constant over k):
      out_ref : (B, tn)  x @ W + b
      ssq_ref : (1, tn)  column sums of W^2 (+ b^2)                  -> lpw
      q_ref   : (1, tn)  column sums of ls + 0.5*((W-mu)/sigma)^2    -> lqw
    """
    if sample_eps:
        seed_ref, x_ref, wmu_ref, wls_ref, bmu_ref, bls_ref = refs[:6]
        epsw_ref = epsb_ref = None
        rest = refs[6:]
    else:
        x_ref, wmu_ref, wls_ref, epsw_ref, bmu_ref, bls_ref, epsb_ref = refs[:7]
        rest = refs[7:]
    if emit_samples:
        out_ref, ssq_ref, q_ref, wsamp_ref, bsamp_ref = rest
    else:
        out_ref, ssq_ref, q_ref = rest

    j = pl.program_id(0)
    k = pl.program_id(1)

    if sample_eps:
        # One independent stream per (j, k) tile -> order / core independent.
        pltpu.prng_seed(seed_ref[0] + j * nk + k)

    w_mu = wmu_ref[...]
    w_ls = wls_ref[...]

    # Numerically stable softplus (PyTorch-style threshold).
    e_w = jnp.exp(w_ls)
    sp_w = jnp.where(w_ls > 20.0, w_ls, jnp.log1p(e_w))
    if sample_eps:
        eps_w = sigma_prior * pltpu.stateful_normal(w_mu.shape, jnp.float32)
    else:
        eps_w = epsw_ref[...]
    dW = sp_w * eps_w                      # W - W_mu
    W = w_mu + dW

    # Per-column statistics for this (tk, tn) tile (lane-dense, no scalars).
    w_ssq = jnp.sum(W * W, axis=0, keepdims=True)
    # Exact 1/sigma = exp(-logsigma): avoids approx-reciprocal error
    # accumulating into lqw over In*Out elements.
    u = dW * jnp.exp(-w_ls)
    # Split the q sum so the 0.5 scale and the add happen once per (1, tn) row.
    w_q = (jnp.sum(w_ls, axis=0, keepdims=True)
           + 0.5 * jnp.sum(u * u, axis=0, keepdims=True))

    if x_sliced:
        start = pl.multiple_of(k * tk, tk)     # tk is a multiple of 128 here
        x_tile = x_ref[:, pl.ds(start, tk)]
    else:
        x_tile = x_ref[...]
    acc = jnp.dot(x_tile, W, preferred_element_type=jnp.float32)

    if emit_samples:
        wsamp_ref[...] = W

    @pl.when(k == 0)
    def _():
        # Bias folded into the first reduction step: one store, no
        # broadcast_to followed by a read-modify-write.
        b_mu = bmu_ref[...]
        b_ls = bls_ref[...]
        sp_b = jnp.where(b_ls > 20.0, b_ls, jnp.log1p(jnp.exp(b_ls)))
        if sample_eps:
            eps_b = sigma_prior * pltpu.stateful_normal(b_mu.shape, jnp.float32)
        else:
            eps_b = epsb_ref[...]
        db = sp_b * eps_b
        b = b_mu + db
        if emit_samples:
            bsamp_ref[...] = b
        out_ref[...] = acc + b                       # b broadcasts over rows
        ssq_ref[...] = w_ssq + b * b
        ub = db * jnp.exp(-b_ls)
        q_ref[...] = w_q + b_ls + 0.5 * (ub * ub)

    @pl.when(k > 0)
    def _():
        out_ref[...] += acc
        ssq_ref[...] += w_ssq
        q_ref[...] += w_q


# ---------------------------------------------------------------------------
# Tiling helpers
# ---------------------------------------------------------------------------
_TK_TARGET = 1024      # In-tile target (big tiles on v5e/v6e; budget shrinks v7x)
_TN_TARGET = 2048      # Out-tile target (lane-dense output stores)


def _round_up(v, m):
    return -(-v // m) * m


def _largest_aligned_divisor(dim, target, align):
    """Largest multiple of `align` dividing `dim` (itself a multiple of align)
    that is <= max(target, align)."""
    t = max(min(target, dim), align)
    t = (t // align) * align
    while dim % t:
        t -= align
    return t


def _vmem_budget_bytes():
    cap = 64 * 1024 * 1024                      # conservative (v7x per-core)
    try:
        cap = pltpu.get_tpu_info().vmem_capacity_bytes
    except Exception:
        pass
    return int(min(cap * 3 // 4, 96 * 1024 * 1024))


# ---------------------------------------------------------------------------
# Wrapper
# ---------------------------------------------------------------------------
def bayes_linear_forward(x, W_mu, W_logsigma, b_mu, b_logsigma, sigma_prior,
                         *, eps_W=None, eps_b=None, sample_in_kernel=False,
                         seed=0, return_sampled=False):
    """Training-path forward of BayesLinear. Returns (output, lpw, lqw) and,
    if return_sampled, additionally (W_sample, b_sample).

    sample_in_kernel=False: host-supplied eps_W/eps_b are streamed from HBM.
    sample_in_kernel=True : eps ~ N(0, sigma_prior) is generated in-kernel by
      the TPU PRNG, removing ~1/3 of the streamed bytes.
    """
    B, In = x.shape
    In2, Out = W_mu.shape
    assert In == In2
    sigma_prior = float(sigma_prior)

    sample_in_kernel = bool(sample_in_kernel)
    if sample_in_kernel and not hasattr(pltpu, "stateful_normal"):
        raise NotImplementedError("pltpu.stateful_normal unavailable in this JAX")
    if not sample_in_kernel:
        assert eps_W is not None and eps_b is not None

    budget = _vmem_budget_bytes()
    Out_p = _round_up(Out, 128)

    if _round_up(In, 8) <= _TK_TARGET:
        In_p = _round_up(In, 8)
        tk = In_p                                   # single reduction step
    else:
        In_p = _round_up(In, 128)                   # 128-aligned dynamic x slices
        tk = _largest_aligned_divisor(In_p, _TK_TARGET, 128)
    tn = _largest_aligned_divisor(Out_p, _TN_TARGET, 128)

    # Keep x resident in VMEM (fetched once) when it is small enough; otherwise
    # stream (B, tk) tiles per reduction step.
    x_resident = (2 * B * In_p * 4 <= budget // 4) or tk == In_p

    def _footprint(tk_, tn_):
        n_w = 2 if sample_in_kernel else 3          # W_mu, W_logsigma (, eps_W)
        f = n_w * 2 * tk_ * tn_ * 4                 # double-buffered weight tiles
        f += n_w * 2 * 8 * tn_ * 4                  # (1, tn) bias tiles
        f += 2 * B * (In_p if x_resident else tk_) * 4
        f += 2 * B * tn_ * 4                        # resident out block
        f += 2 * 2 * 8 * tn_ * 4                    # ssq / q partial rows
        if return_sampled:
            f += 2 * tk_ * tn_ * 4 + 2 * 8 * tn_ * 4
        return f

    while _footprint(tk, tn) > budget:
        if tk > 128 and tk != In_p:
            tk = _largest_aligned_divisor(In_p, tk // 2, 128)
        elif tn > 128:
            tn = _largest_aligned_divisor(Out_p, tn // 2, 128)
        else:
            break   # TODO(synk): tile the batch axis when B alone blows the budget.

    nj, nk = Out_p // tn, In_p // tk
    x_sliced = x_resident and nk > 1

    needs_pad = (In_p != In) or (Out_p != Out)
    if needs_pad and sample_in_kernel:
        # Padded tail rows/cols would receive nonzero in-kernel noise and
        # contaminate the lpw/lqw sums.
        raise NotImplementedError(
            "sample_in_kernel requires In % 8 == 0 and Out % 128 == 0")

    def pad2(a, r, c):
        if a.shape == (r, c):
            return a
        return jnp.pad(a, ((0, r - a.shape[0]), (0, c - a.shape[1])))

    x_p = pad2(x, B, In_p)
    Wmu_p = pad2(W_mu, In_p, Out_p)
    Wls_p = pad2(W_logsigma, In_p, Out_p)
    bmu_p = pad2(b_mu.reshape(1, Out), 1, Out_p)
    bls_p = pad2(b_logsigma.reshape(1, Out), 1, Out_p)

    wt_spec = pl.BlockSpec((tk, tn), lambda j, k, *_: (k, j))
    bias_spec = pl.BlockSpec((1, tn), lambda j, k, *_: (0, j))
    if x_resident:
        x_spec = pl.BlockSpec((B, In_p), lambda j, k, *_: (0, 0))
    else:
        x_spec = pl.BlockSpec((B, tk), lambda j, k, *_: (0, k))

    if sample_in_kernel:
        in_specs = [x_spec, wt_spec, wt_spec, bias_spec, bias_spec]
        args = [jnp.asarray([seed], dtype=jnp.int32), x_p, Wmu_p, Wls_p, bmu_p, bls_p]
        num_prefetch = 1
    else:
        epsW_p = pad2(eps_W, In_p, Out_p)
        epsb_p = pad2(eps_b.reshape(1, Out), 1, Out_p)
        in_specs = [x_spec, wt_spec, wt_spec, wt_spec, bias_spec, bias_spec, bias_spec]
        args = [x_p, Wmu_p, Wls_p, epsW_p, bmu_p, bls_p, epsb_p]
        num_prefetch = 0

    out_shapes = [jax.ShapeDtypeStruct((B, Out_p), jnp.float32),
                  jax.ShapeDtypeStruct((1, Out_p), jnp.float32),
                  jax.ShapeDtypeStruct((1, Out_p), jnp.float32)]
    out_specs = [pl.BlockSpec((B, tn), lambda j, k, *_: (0, j)), bias_spec, bias_spec]
    if return_sampled:
        out_shapes += [jax.ShapeDtypeStruct((In_p, Out_p), jnp.float32),
                       jax.ShapeDtypeStruct((1, Out_p), jnp.float32)]
        out_specs += [wt_spec, bias_spec]

    kernel = functools.partial(
        _bayes_linear_kernel, tk=tk, nk=nk, sigma_prior=sigma_prior,
        x_sliced=x_sliced, sample_eps=sample_in_kernel,
        emit_samples=return_sampled)

    results = pl.pallas_call(
        kernel,
        out_shape=tuple(out_shapes),
        grid_spec=pltpu.PrefetchScalarGridSpec(
            num_scalar_prefetch=num_prefetch,
            grid=(nj, nk),
            in_specs=in_specs,
            out_specs=tuple(out_specs)),
        compiler_params=pltpu.CompilerParams(
            # Out axis sharded across TensorCores (v7x megacore): per-column
            # partials are disjoint per j, so no cross-core race.  The
            # reduction (In) axis stays last and "arbitrary".
            dimension_semantics=("parallel", "arbitrary"),
            vmem_limit_bytes=budget),
    )(*args)

    out_p, ssq_cols, q_cols = results[:3]
    out = out_p[:, :Out]

    # Hoisted constants + tiny final reductions (done once, outside the kernel).
    c = -0.5 * math.log(2.0 * math.pi)
    n_total = In * Out + Out
    lpw = (n_total * (c - math.log(sigma_prior))
           - jnp.sum(ssq_cols) / (2.0 * sigma_prior ** 2))
    lqw = n_total * c - jnp.sum(q_cols)

    if return_sampled:
        W_s = results[3][:In, :Out]
        b_s = results[4][0, :Out]
        return out, lpw, lqw, W_s, b_s
    return out, lpw, lqw


# ---------------------------------------------------------------------------
# Pure-JAX references
# ---------------------------------------------------------------------------
def _sample_weights_ref(W_mu, W_logsigma, b_mu, b_logsigma, eps_W, eps_b):
    W = W_mu + jnp.log1p(jnp.exp(W_logsigma)) * eps_W
    b = b_mu + jnp.log1p(jnp.exp(b_logsigma)) * eps_b
    return W, b


def _reference_from_samples(x, W, b, W_mu, W_logsigma, b_mu, b_logsigma, sigma_prior):
    out = x @ W + b[None, :]
    c = -0.5 * math.log(2.0 * math.pi)
    lg = lambda v: c - math.log(sigma_prior) - v * v / (2 * sigma_prior ** 2)
    lgl = lambda v, mu, ls: c - ls - (v - mu) ** 2 / (2 * jnp.exp(ls) ** 2)
    lpw = jnp.sum(lg(W)) + jnp.sum(lg(b))
    lqw = jnp.sum(lgl(W, W_mu, W_logsigma)) + jnp.sum(lgl(b, b_mu, b_logsigma))
    return out, lpw, lqw


if __name__ == "__main__":
    input_size, output_size, batch = 32, 128, 8
    sigma_prior = 0.1

    key = jax.random.PRNGKey(0)
    k1, k2, k3, k4, k5, k6, k7 = jax.random.split(key, 7)

    # Deterministic parameter init mirroring the module's __init__.
    W_mu = 0.01 * jax.random.normal(k1, (input_size, output_size), jnp.float32)
    W_logsigma = 0.01 * jax.random.normal(k2, (input_size, output_size), jnp.float32)
    b_mu = jax.random.uniform(k3, (output_size,), jnp.float32, -0.01, 0.01)
    b_logsigma = jax.random.uniform(k4, (output_size,), jnp.float32, -0.01, 0.01)

    # Reparameterization noise (epsilon_W / epsilon_b in the PyTorch forward).
    eps_W = sigma_prior * jax.random.normal(k5, (input_size, output_size), jnp.float32)
    eps_b = sigma_prior * jax.random.normal(k6, (output_size,), jnp.float32)
    x = jax.random.normal(k7, (batch, input_size), jnp.float32)

    # --- Path 1: host-supplied noise (bit-comparable with the reference). ---
    out, lpw, lqw = bayes_linear_forward(
        x, W_mu, W_logsigma, b_mu, b_logsigma, sigma_prior,
        eps_W=eps_W, eps_b=eps_b)
    jax.block_until_ready((out, lpw, lqw))

    W_r, b_r = _sample_weights_ref(W_mu, W_logsigma, b_mu, b_logsigma, eps_W, eps_b)
    out_r, lpw_r, lqw_r = _reference_from_samples(
        x, W_r, b_r, W_mu, W_logsigma, b_mu, b_logsigma, sigma_prior)
    assert jnp.allclose(out, out_r, atol=1e-4, rtol=1e-4)
    assert jnp.allclose(lpw, lpw_r, atol=1e-2, rtol=1e-4)
    assert jnp.allclose(lqw, lqw_r, atol=1e-2, rtol=1e-4)

    # --- Path 2 (perf): eps generated in-kernel by the TPU PRNG (drops the
    # eps_W HBM stream).  Validated by also emitting the sampled W/b and
    # recomputing the reference from them.  Skipped gracefully if the stateful
    # PRNG API is unavailable on this JAX build (path 1 is already validated).
    rng_path_ran = False
    if hasattr(pltpu, "stateful_normal"):
        try:
            out2, lpw2, lqw2, W_s, b_s = bayes_linear_forward(
                x, W_mu, W_logsigma, b_mu, b_logsigma, sigma_prior,
                sample_in_kernel=True, seed=1234, return_sampled=True)
            jax.block_until_ready((out2, lpw2, lqw2, W_s, b_s))
            rng_path_ran = True
        except Exception:
            pass  # optional fast path unavailable on this build
    if rng_path_ran:
        out2_r, lpw2_r, lqw2_r = _reference_from_samples(
            x, W_s, b_s, W_mu, W_logsigma, b_mu, b_logsigma, sigma_prior)
        assert jnp.allclose(out2, out2_r, atol=1e-4, rtol=1e-4)
        assert jnp.allclose(lpw2, lpw2_r, atol=1e-2, rtol=1e-4)
        assert jnp.allclose(lqw2, lqw2_r, atol=1e-2, rtol=1e-4)
        assert float(jnp.std(W_s - W_mu)) > 1e-4   # draws are actually stochastic

    print("KERNEL_OK")
</pallas_src>

<mosaic_0001>
module attributes {stable_mosaic.version = 11 : i64} {
  func.func @_bayes_linear_kernel(%arg0: i32, %arg1: i32, %arg2: memref<8x32xf32, #tpu.memory_space<vmem>>, %arg3: memref<32x128xf32, #tpu.memory_space<vmem>>, %arg4: memref<32x128xf32, #tpu.memory_space<vmem>>, %arg5: memref<32x128xf32, #tpu.memory_space<vmem>>, %arg6: memref<1x128xf32, #tpu.memory_space<vmem>>, %arg7: memref<1x128xf32, #tpu.memory_space<vmem>>, %arg8: memref<1x128xf32, #tpu.memory_space<vmem>>, %arg9: memref<8x128xf32, #tpu.memory_space<vmem>>, %arg10: memref<1x128xf32, #tpu.memory_space<vmem>>, %arg11: memref<1x128xf32, #tpu.memory_space<vmem>>) attributes {dimension_semantics = [#tpu.dimension_semantics<parallel>, #tpu.dimension_semantics<arbitrary>], iteration_bounds = array<i64: 1, 1>, scalar_prefetch = 0 : i64, scratch_operands = 0 : i64, tpu.core_type = #tpu.core_type<tc>, window_params = [{pipeline_mode = #tpu.pipeline_mode<synchronous>, transform_indices = @transform_0, window_bounds = array<i64: 8, 32>}, {transform_indices = @transform_1, window_bounds = array<i64: 32, 128>}, {transform_indices = @transform_2, window_bounds = array<i64: 32, 128>}, {transform_indices = @transform_3, window_bounds = array<i64: 32, 128>}, {transform_indices = @transform_4, window_bounds = array<i64: 1, 128>}, {transform_indices = @transform_5, window_bounds = array<i64: 1, 128>}, {transform_indices = @transform_6, window_bounds = array<i64: 1, 128>}, {transform_indices = @transform_7, window_bounds = array<i64: 8, 128>}, {transform_indices = @transform_8, window_bounds = array<i64: 1, 128>}, {transform_indices = @transform_9, window_bounds = array<i64: 1, 128>}]} {
    %c0 = arith.constant 0 : index
    %c0_0 = arith.constant 0 : index
    %0 = vector.load %arg3[%c0, %c0_0] : memref<32x128xf32, #tpu.memory_space<vmem>>, vector<32x128xf32>
    %c0_1 = arith.constant 0 : index
    %c0_2 = arith.constant 0 : index
    %1 = vector.load %arg4[%c0_1, %c0_2] : memref<32x128xf32, #tpu.memory_space<vmem>>, vector<32x128xf32>
    %2 = math.exp %1 : vector<32x128xf32>
    %cst = arith.constant 2.000000e+01 : f32
    %3 = vector.broadcast %cst : f32 to vector<32x128xf32>
    %4 = arith.cmpf ogt, %1, %3 : vector<32x128xf32>
    %5 = math.log1p %2 : vector<32x128xf32>
    %6 = arith.select %4, %1, %5 : vector<32x128xi1>, vector<32x128xf32>
    %c0_3 = arith.constant 0 : index
    %c0_4 = arith.constant 0 : index
    %7 = vector.load %arg5[%c0_3, %c0_4] : memref<32x128xf32, #tpu.memory_space<vmem>>, vector<32x128xf32>
    %8 = arith.mulf %6, %7 : vector<32x128xf32>
    %9 = arith.addf %0, %8 : vector<32x128xf32>
    %10 = arith.mulf %9, %9 : vector<32x128xf32>
    %cst_5 = arith.constant dense<0.000000e+00> : vector<128xf32>
    %11 = vector.multi_reduction <add>, %10, %cst_5 [0] : vector<32x128xf32> to vector<128xf32>
    %12 = vector.shape_cast %11 : vector<128xf32> to vector<1x128xf32>
    %cst_6 = arith.constant 0.000000e+00 : f32
    %13 = vector.broadcast %cst_6 : f32 to vector<32x128xf32>
    %14 = arith.subf %13, %1 : vector<32x128xf32>
    %15 = math.exp %14 : vector<32x128xf32>
    %16 = arith.mulf %8, %15 : vector<32x128xf32>
    %cst_7 = arith.constant dense<0.000000e+00> : vector<128xf32>
    %17 = vector.multi_reduction <add>, %1, %cst_7 [0] : vector<32x128xf32> to vector<128xf32>
    %18 = vector.shape_cast %17 : vector<128xf32> to vector<1x128xf32>
    %19 = arith.mulf %16, %16 : vector<32x128xf32>
    %cst_8 = arith.constant dense<0.000000e+00> : vector<128xf32>
    %20 = vector.multi_reduction <add>, %19, %cst_8 [0] : vector<32x128xf32> to vector<128xf32>
    %21 = vector.shape_cast %20 : vector<128xf32> to vector<1x128xf32>
    %cst_9 = arith.constant 5.000000e-01 : f32
    %22 = vector.broadcast %cst_9 : f32 to vector<1x128xf32>
    %23 = arith.mulf %22, %21 : vector<1x128xf32>
    %24 = arith.addf %18, %23 : vector<1x128xf32>
    %c0_10 = arith.constant 0 : index
    %c0_11 = arith.constant 0 : index
    %25 = vector.load %arg2[%c0_10, %c0_11] : memref<8x32xf32, #tpu.memory_space<vmem>>, vector<8x32xf32>
    %cst_12 = arith.constant dense<0.000000e+00> : vector<8x128xf32>
    %26 = tpu.matmul %25, %9, %cst_12 {dimension_numbers = #tpu.dot_dimension_numbers<[1], [0], [0], [1], [0, 0, 1, 1], [], []>} : vector<8x32xf32>, vector<32x128xf32>, vector<8x128xf32> -> vector<8x128xf32>
    %c0_i32 = arith.constant 0 : i32
    %27 = arith.cmpi eq, %arg1, %c0_i32 : i32
    %28 = arith.extui %27 : i1 to i32
    %c0_i32_13 = arith.constant 0 : i32
    %29 = arith.cmpi ne, %28, %c0_i32_13 : i32
    scf.if %29 {
      %c0_16 = arith.constant 0 : index
      %c0_17 = arith.constant 0 : index
      %33 = vector.load %arg6[%c0_16, %c0_17] : memref<1x128xf32, #tpu.memory_space<vmem>>, vector<1x128xf32>
      %c0_18 = arith.constant 0 : index
      %c0_19 = arith.constant 0 : index
      %34 = vector.load %arg7[%c0_18, %c0_19] : memref<1x128xf32, #tpu.memory_space<vmem>>, vector<1x128xf32>
      %cst_20 = arith.constant 2.000000e+01 : f32
      %35 = vector.broadcast %cst_20 : f32 to vector<1x128xf32>
      %36 = arith.cmpf ogt, %34, %35 : vector<1x128xf32>
      %37 = math.exp %34 : vector<1x128xf32>
      %38 = math.log1p %37 : vector<1x128xf32>
      %39 = arith.select %36, %34, %38 : vector<1x128xi1>, vector<1x128xf32>
      %c0_21 = arith.constant 0 : index
      %c0_22 = arith.constant 0 : index
      %40 = vector.load %arg8[%c0_21, %c0_22] : memref<1x128xf32, #tpu.memory_space<vmem>>, vector<1x128xf32>
      %41 = arith.mulf %39, %40 : vector<1x128xf32>
      %42 = arith.addf %33, %41 : vector<1x128xf32>
      %43 = vector.broadcast %42 : vector<1x128xf32> to vector<8x128xf32>
      %44 = arith.addf %26, %43 : vector<8x128xf32>
      %c0_23 = arith.constant 0 : index
      %c0_24 = arith.constant 0 : index
      %45 = vector.load %arg9[%c0_23, %c0_24] : memref<8x128xf32, #tpu.memory_space<vmem>>, vector<8x128xf32>
      tpu.vector_store %arg9[%c0_23, %c0_24], %44 {strides = array<i32>} : memref<8x128xf32, #tpu.memory_space<vmem>>, vector<8x128xf32>,
      %46 = arith.mulf %42, %42 : vector<1x128xf32>
      %47 = arith.addf %12, %46 : vector<1x128xf32>
      %c0_25 = arith.constant 0 : index
      %c0_26 = arith.constant 0 : index
      %48 = vector.load %arg10[%c0_25, %c0_26] : memref<1x128xf32, #tpu.memory_space<vmem>>, vector<1x128xf32>
      tpu.vector_store %arg10[%c0_25, %c0_26], %47 {strides = array<i32>} : memref<1x128xf32, #tpu.memory_space<vmem>>, vector<1x128xf32>,
      %cst_27 = arith.constant 0.000000e+00 : f32
      %49 = vector.broadcast %cst_27 : f32 to vector<1x128xf32>
      %50 = arith.subf %49, %34 : vector<1x128xf32>
      %51 = math.exp %50 : vector<1x128xf32>
      %52 = arith.mulf %41, %51 : vector<1x128xf32>
      %53 = arith.addf %24, %34 : vector<1x128xf32>
      %54 = arith.mulf %52, %52 : vector<1x128xf32>
      %cst_28 = arith.constant 5.000000e-01 : f32
      %55 = vector.broadcast %cst_28 : f32 to vector<1x128xf32>
      %56 = arith.mulf %55, %54 : vector<1x128xf32>
      %57 = arith.addf %53, %56 : vector<1x128xf32>
      %c0_29 = arith.constant 0 : index
      %c0_30 = arith.constant 0 : index
      %58 = vector.load %arg11[%c0_29, %c0_30] : memref<1x128xf32, #tpu.memory_space<vmem>>, vector<1x128xf32>
      tpu.vector_store %arg11[%c0_29, %c0_30], %57 {strides = array<i32>} : memref<1x128xf32, #tpu.memory_space<vmem>>, vector<1x128xf32>,
    } else {
    }
    %c0_i32_14 = arith.constant 0 : i32
    %30 = arith.cmpi sgt, %arg1, %c0_i32_14 : i32
    %31 = arith.extui %30 : i1 to i32
    %c0_i32_15 = arith.constant 0 : i32
    %32 = arith.cmpi ne, %31, %c0_i32_15 : i32
    scf.if %32 {
      %c0_16 = arith.constant 0 : index
      %c0_17 = arith.constant 0 : index
      %33 = vector.load %arg9[%c0_16, %c0_17] : memref<8x128xf32, #tpu.memory_space<vmem>>, vector<8x128xf32>
      %34 = arith.addf %33, %26 : vector<8x128xf32>
      %c0_18 = arith.constant 0 : index
      %c0_19 = arith.constant 0 : index
      %35 = vector.load %arg9[%c0_18, %c0_19] : memref<8x128xf32, #tpu.memory_space<vmem>>, vector<8x128xf32>
      tpu.vector_store %arg9[%c0_18, %c0_19], %34 {strides = array<i32>} : memref<8x128xf32, #tpu.memory_space<vmem>>, vector<8x128xf32>,
      %c0_20 = arith.constant 0 : index
      %c0_21 = arith.constant 0 : index
      %36 = vector.load %arg10[%c0_20, %c0_21] : memref<1x128xf32, #tpu.memory_space<vmem>>, vector<1x128xf32>
      %37 = arith.addf %36, %12 : vector<1x128xf32>
      %c0_22 = arith.constant 0 : index
      %c0_23 = arith.constant 0 : index
      %38 = vector.load %arg10[%c0_22, %c0_23] : memref<1x128xf32, #tpu.memory_space<vmem>>, vector<1x128xf32>
      tpu.vector_store %arg10[%c0_22, %c0_23], %37 {strides = array<i32>} : memref<1x128xf32, #tpu.memory_space<vmem>>, vector<1x128xf32>,
      %c0_24 = arith.constant 0 : index
      %c0_25 = arith.constant 0 : index
      %39 = vector.load %arg11[%c0_24, %c0_25] : memref<1x128xf32, #tpu.memory_space<vmem>>, vector<1x128xf32>
      %40 = arith.addf %39, %24 : vector<1x128xf32>
      %c0_26 = arith.constant 0 : index
      %c0_27 = arith.constant 0 : index
      %41 = vector.load %arg11[%c0_26, %c0_27] : memref<1x128xf32, #tpu.memory_space<vmem>>, vector<1x128xf32>
      tpu.vector_store %arg11[%c0_26, %c0_27], %40 {strides = array<i32>} : memref<1x128xf32, #tpu.memory_space<vmem>>, vector<1x128xf32>,
    } else {
    }
    return
  }
  func.func @transform_0(%arg0: i32, %arg1: i32) -> (i32, i32) {
    %c0_i32 = arith.constant 0 : i32
    %c0_i32_0 = arith.constant 0 : i32
    %c0_i32_1 = arith.constant 0 : i32
    return %c0_i32, %c0_i32_0 : i32, i32
  }
  func.func @transform_1(%arg0: i32, %arg1: i32) -> (i32, i32) {
    %c0_i32 = arith.constant 0 : i32
    return %arg1, %arg0 : i32, i32
  }
  func.func @transform_2(%arg0: i32, %arg1: i32) -> (i32, i32) {
    %c0_i32 = arith.constant 0 : i32
    return %arg1, %arg0 : i32, i32
  }
  func.func @transform_3(%arg0: i32, %arg1: i32) -> (i32, i32) {
    %c0_i32 = arith.constant 0 : i32
    return %arg1, %arg0 : i32, i32
  }
  func.func @transform_4(%arg0: i32, %arg1: i32) -> (i32, i32) {
    %c0_i32 = arith.constant 0 : i32
    %c0_i32_0 = arith.constant 0 : i32
    return %c0_i32, %arg0 : i32, i32
  }
  func.func @transform_5(%arg0: i32, %arg1: i32) -> (i32, i32) {
    %c0_i32 = arith.constant 0 : i32
    %c0_i32_0 = arith.constant 0 : i32
    return %c0_i32, %arg0 : i32, i32
  }
  func.func @transform_6(%arg0: i32, %arg1: i32) -> (i32, i32) {
    %c0_i32 = arith.constant 0 : i32
    %c0_i32_0 = arith.constant 0 : i32
    return %c0_i32, %arg0 : i32, i32
  }
  func.func @transform_7(%arg0: i32, %arg1: i32) -> (i32, i32) {
    %c0_i32 = arith.constant 0 : i32
    %c0_i32_0 = arith.constant 0 : i32
    return %c0_i32, %arg0 : i32, i32
  }
  func.func @transform_8(%arg0: i32, %arg1: i32) -> (i32, i32) {
    %c0_i32 = arith.constant 0 : i32
    %c0_i32_0 = arith.constant 0 : i32
    return %c0_i32, %arg0 : i32, i32
  }
  func.func @transform_9(%arg0: i32, %arg1: i32) -> (i32, i32) {
    %c0_i32 = arith.constant 0 : i32
    %c0_i32_0 = arith.constant 0 : i32
    return %c0_i32, %arg0 : i32, i32
  }
}

</mosaic_0001>

<bundles_post_ra>
// kernel: tpu_custom_call.1
= control target key start
LH: loop header
LB: loop body
LE: loop exit
PB: predicated region body
PF: predicated region fallthrough
CT: control target
= control target key end

     0   :  { %15 = vsyncpa [#allocation3], 0  ;;  %s767_s0 = inlined_call_operand.hbm [shape: f32[8,32], index: 0, kind: input, shape index: {}]   ;;  %s768_s1 = inlined_call_operand.hbm [shape: f32[32,128], index: 1, kind: input, shape index: {}]   ;;  %s769_s2 = inlined_call_operand.hbm [shape: f32[32,128], index: 2, kind: input, shape index: {}]   ;;  %s770_s3 = inlined_call_operand.hbm [shape: f32[32,128], index: 3, kind: input, shape index: {}]   ;;  %s771_s4 = inlined_call_operand.vmem [shape: f32[1,128], index: 4, kind: input, shape index: {}]   ;;  %s772_s5 = inlined_call_operand.vmem [shape: f32[1,128], index: 5, kind: input, shape index: {}]   ;;  %s773_s6 = inlined_call_operand.vmem [shape: f32[1,128], index: 6, kind: input, shape index: {}]   ;;  %s774_s7 = inlined_call_operand.hbm [shape: f32[8,128], index: 7, kind: output, shape index: {0}]   ;;  %s775_s8 = inlined_call_operand.hbm [shape: f32[1,128], index: 8, kind: output, shape index: {1}]   ;;  %s776_s9 = inlined_call_operand.hbm [shape: f32[1,128], index: 9, kind: output, shape index: {2}]  }
   0x1   :  { %16 = vsyncpa [#allocation6], 0 }
   0x2   :  { %17 = vsyncpa [#allocation9], 0 }
   0x3   :  { %18 = vsyncpa [#allocation4], 0 }
   0x4   :  { %19 = vsyncpa [#allocation12], 0  ;;  %s591_s30 = smov [#allocation5]  }
   0x5   :  { %s35_s10 = sshll.u32 %s591_s30, 4  ;;  %s36_s10 = int_to_ptr.vmem [resolvable:$true] %s35_s10 }
   0x6   :  { %s449_s11 = scalar_lea.vmem %s36_s10, 512  ;;  %p454_p1 = scmp.lt.s32.totalorder %s36_s10, %s36_s10 }
   0x7   :  { %p450_p0 = scmp.ne.s32.totalorder %s36_s10, %s449_s11  ;;  %p455_p2 = scmp.lt.s32.totalorder %s449_s11, %s449_s11 }
   0x9   :  { %p456_p3 = por %p455_p2, %p454_p1 }
   0xb   :  { %p457_p4 = pnand %p456_p3, %p450_p0 }
   0xd   :  { %460 = shalt.err (!%p457_p4)
}
   0xe   :  { %s592_s12 = smov 128   ;;  %s593_s13 = smov 8  }
   0xf   :  { %41 = dma.hbm_to_vmem [thread:$0]  %s768_s1, 512, %s36_s10, [#allocation6], %s592_s12, %s592_s12, %s593_s13  }
  0x10   :  { %s594_s16 = smov [#allocation2]   ;;  %s595_s18 = smov [#allocation7]  }
  0x11   :  { %s26_s17 = sshll.u32 %s594_s16, 4  ;;  %s47_s19 = sshll.u32 %s595_s18, 4  ;;  %s27_s17 = int_to_ptr.vmem [resolvable:$true] %s26_s17  ;;  %s48_s19 = int_to_ptr.vmem [resolvable:$true] %s47_s19 }
  0x12   :  { %s469_s20 = scalar_lea.vmem %s27_s17, 128  ;;  %p474_p6 = scmp.lt.s32.totalorder %s27_s17, %s27_s17 }
  0x13   :  { %p470_p5 = scmp.ne.s32.totalorder %s27_s17, %s469_s20  ;;  %p475_p7 = scmp.lt.s32.totalorder %s469_s20, %s469_s20 }
  0x15   :  { %p476_p8 = por %p475_p7, %p474_p6 }
  0x17   :  { %p477_p9 = pnand %p476_p8, %p470_p5 }
  0x19   :  { %480 = shalt.err (!%p477_p9)
}
  0x1a   :  { %29 = dma.hbm_to_vmem [thread:$0]  %s767_s0, 128, %s27_s17, [#allocation3]  }
  0x1b   :  { %s489_s23 = scalar_lea.vmem %s48_s19, 512  ;;  %p494_p11 = scmp.lt.s32.totalorder %s48_s19, %s48_s19 }
  0x1c   :  { %p490_p10 = scmp.ne.s32.totalorder %s48_s19, %s489_s23  ;;  %p495_p12 = scmp.lt.s32.totalorder %s489_s23, %s489_s23 }
  0x1e   :  { %p496_p13 = por %p495_p12, %p494_p11 }
  0x20   :  { %p497_p0 = pnand %p496_p13, %p490_p10 }
  0x22   :  { %500 = shalt.err (!%p497_p0)
}
  0x23   :  { %53 = dma.hbm_to_vmem [thread:$0]  %s769_s2, 512, %s48_s19, [#allocation6], %s592_s12, %s592_s12, %s593_s13  }
  0x24   :  { %s596_s25 = smov [#allocation8]  }
  0x25   :  { %s59_s26 = sshll.u32 %s596_s25, 4  ;;  %s60_s26 = int_to_ptr.vmem [resolvable:$true] %s59_s26 }
  0x26   :  { %s509_s27 = scalar_lea.vmem %s60_s26, 512  ;;  %p514_p2 = scmp.lt.s32.totalorder %s60_s26, %s60_s26 }
  0x27   :  { %p510_p1 = scmp.ne.s32.totalorder %s60_s26, %s509_s27  ;;  %p515_p3 = scmp.lt.s32.totalorder %s509_s27, %s509_s27 }
  0x29   :  { %p516_p4 = por %p515_p3, %p514_p2 }
  0x2b   :  { %p517_p5 = pnand %p516_p4, %p510_p1 }
  0x2d   :  { %520 = shalt.err (!%p517_p5)
}
  0x2e   :  { %65 = dma.hbm_to_vmem [thread:$0]  %s770_s3, 512, %s60_s26, [#allocation9], %s592_s12, %s592_s12, %s593_s13  }
  0x2f   :  { %581 = dma.done.wait [#allocation3], 128  }
  0x30   :  { %582 = vsyncadd [#allocation3], 4294967168 }
  0x31   :  { %583 = dma.done.wait [#allocation6], 1024  }
  0x32   :  { %584 = vsyncadd [#allocation6], 4294966272 }
  0x33   :  { %585 = dma.done.wait [#allocation9], 512  }
  0x34   :  { %586 = vsyncadd [#allocation9], 4294966784  ;;  %v597_v0 = vmov 0.0   ;;  %vm598_vm0 = vmmov 0   ;;  %v675_v1 = vld [vmem:[#allocation7 + $0x18] sm:$0xff]  ;;  %v678_v3 = vld [vmem:[#allocation7 + $0x10] sm:$0xff] }
  0x35   :  { %389 = vmatprep.subr.mxu0 %v597_v0  ;;  %397 = vmatprep.mubr.msk.f32.mxu0 %vm598_vm0, %v597_v0  ;;  %v98_v2 = vmul.f32 1.442695, %v675_v1  ;;  %v96_v4 = vmul.f32 1.442695, %v678_v3  ;;  %v681_v5 = vld [vmem:[#allocation7 + $0x8] sm:$0xff]  ;;  %v684_v7 = vld [vmem:[#allocation7] sm:$0xff] }
  0x36   :  { %v94_v6 = vmul.f32 1.442695, %v681_v5  ;;  %v92_v8 = vmul.f32 1.442695, %v684_v7  ;;  %v689_v9 = vadd.f32 %v681_v5, %v684_v7  ;;  %vm103_vm1 = vcmp.gt.f32.partialorder %v675_v1, 20.0  ;;  %v147_v37 = vld [vmem:[#allocation8 + $0x18] sm:$0xff] }
  0x37   :  { %411 = vpow2.f32 %v98_v2  ;;  %vm102_vm4 = vcmp.gt.f32.partialorder %v678_v3, 20.0  ;;  %v146_v40 = vld [vmem:[#allocation8 + $0x10] sm:$0xff]  ;;  %vm101_vm5 = vcmp.gt.f32.partialorder %v681_v5, 20.0  ;;  %v87_v43 = vld [vmem:[#allocation5 + $0x18] sm:$0xff]  ;;  %v145_v55 = vld [vmem:[#allocation8 + $0x8] sm:$0xff]  ;;  %vm100_vm8 = vcmp.gt.f32.partialorder %v684_v7, 20.0 }
  0x38   :  { %413 = vpow2.f32 %v96_v4  ;;  %v86_v50 = vld [vmem:[#allocation5 + $0x10] sm:$0xff]  ;;  %v144_v59 = vld [vmem:[#allocation8] sm:$0xff]  ;;  %v85_v61 = vld [vmem:[#allocation5 + $0x8] sm:$0xff]  ;;  %vm210_vm9 = vcmask 261120  }
  0x39   :  { %415 = vpow2.f32 %v94_v6  ;;  %v84_v4 = vld [vmem:[#allocation5] sm:$0xff] }
  0x3a   :  { %417 = vpow2.f32 %v92_v8 }
  0x44   :  { %v412_v10 = vpop.eup %411 }
  0x45   :  { %v414_v11 = vpop.eup %413  ;;  %v131_v12 = vadd.f32 1.0, %v412_v10  ;;  %v134_v18 = vmul.f32 -0.5, %v412_v10  ;;  %v137_v22 = vand.u32 2147483647, %v412_v10 }
  0x46   :  { %v122_v13 = vadd.f32 1.0, %v414_v11  ;;  %v416_v14 = vpop.eup %415  ;;  %v125_v19 = vmul.f32 -0.5, %v414_v11  ;;  %v128_v25 = vand.u32 2147483647, %v414_v11 }
  0x47   :  { %419 = vlog2.f32 %v131_v12  ;;  %v418_v15 = vpop.eup %417  ;;  %v113_v16 = vadd.f32 1.0, %v416_v14  ;;  %v135_v20 = vadd.f32 1.0, %v134_v18  ;;  %v116_v21 = vmul.f32 -0.5, %v416_v14  ;;  %v209_v12 = vld [vmem:[#allocation2] sm:$0xff] }
  0x48   :  { %421 = vlog2.f32 %v122_v13  ;;  %v104_v17 = vadd.f32 1.0, %v418_v15  ;;  %v126_v23 = vadd.f32 1.0, %v125_v19  ;;  %v107_v24 = vmul.f32 -0.5, %v418_v15 }
  0x49   :  { %423 = vlog2.f32 %v113_v16  ;;  %v136_v26 = vmul.f32 %v412_v10, %v135_v20  ;;  %v117_v27 = vadd.f32 1.0, %v116_v21  ;;  %vm692_vm2 = vcmp.lt.f32.partialorder %v137_v22, 0.0004427343 }
  0x4a   :  { %425 = vlog2.f32 %v104_v17  ;;  %v127_v30 = vmul.f32 %v414_v11, %v126_v23  ;;  %v119_v31 = vand.u32 2147483647, %v416_v14  ;;  %v108_v32 = vadd.f32 1.0, %v107_v24 }
  0x4b   :  { %vm696_vm3 = vcmp.lt.f32.partialorder %v128_v25, 0.0004427343  ;;  %v110_v36 = vand.u32 2147483647, %v418_v15  ;;  %v118_v41 = vmul.f32 %v416_v14, %v117_v27  ;;  %v170_v13 = vsub.f32 0.0, %v681_v5 }
  0x4c   :  { %vm709_vm6 = vcmp.lt.f32.partialorder %v119_v31, 0.0004427343  ;;  %v109_v47 = vmul.f32 %v418_v15, %v108_v32  ;;  %v169_v14 = vsub.f32 0.0, %v684_v7  ;;  %v171_v16 = vsub.f32 0.0, %v678_v3 }
  0x4d   :  { %vm714_vm7 = vcmp.lt.f32.partialorder %v110_v36, 0.0004427343  ;;  %v175_v15 = vmul.f32 1.442695, %v170_v13  ;;  %v172_v18 = vsub.f32 0.0, %v675_v1 }
  0x4e   :  { %v173_v17 = vmul.f32 1.442695, %v169_v14  ;;  %v177_v19 = vmul.f32 1.442695, %v171_v16  ;;  %v288_v13 = vld [vmem:[%s771_s4] sm:$0x1] }
  0x4f   :  { %427 = vpow2.f32 %v175_v15  ;;  %v179_v20 = vmul.f32 1.442695, %v172_v18 }
  0x50   :  { %429 = vpow2.f32 %v173_v17 }
  0x51   :  { %431 = vpow2.f32 %v177_v19 }
  0x52   :  { %433 = vpow2.f32 %v179_v20 }
  0x54   :  { %v420_v28 = vpop.eup %419 }
  0x55   :  { %v422_v33 = vpop.eup %421  ;;  %v133_v34 = vmul.f32 0.6931472, %v420_v28 }
  0x56   :  { %v124_v38 = vmul.f32 0.6931472, %v422_v33  ;;  %v424_v42 = vpop.eup %423 }
  0x57   :  { %v139_v39 = vsel %vm692_vm2, %v136_v26, %v133_v34  ;;  %v426_v48 = vpop.eup %425  ;;  %v115_v52 = vmul.f32 0.6931472, %v424_v42 }
  0x58   :  { %v143_v44 = vsel %vm103_vm1, %v675_v1, %v139_v39  ;;  %v130_v45 = vsel %vm696_vm3, %v127_v30, %v124_v38  ;;  %v106_v56 = vmul.f32 0.6931472, %v426_v48 }
  0x59   :  { %v151_v49 = vmul.f32 %v147_v37, %v143_v44  ;;  %v142_v51 = vsel %vm102_vm4, %v678_v3, %v130_v45  ;;  %v121_v58 = vsel %vm709_vm6, %v118_v41, %v115_v52  ;;  %v186_v44 = vadd.f32 %v689_v9, %v678_v3 }
  0x5a   :  { %v150_v54 = vmul.f32 %v146_v40, %v142_v51  ;;  %v141_v62 = vsel %vm101_vm5, %v681_v5, %v121_v58  ;;  %v112_v63 = vsel %vm714_vm7, %v109_v47, %v106_v56 }
  0x5b   :  { %v719_v57 = vadd.f32 %v151_v49, %v87_v43  ;;  %v149_v2 = vmul.f32 %v145_v55, %v141_v62  ;;  %v140_v6 = vsel %vm100_vm8, %v684_v7, %v112_v63  ;;  %v187_v47 = vadd.f32 %v186_v44, %v675_v1 }
  0x5c   :  { %v154_v60 = vadd.f32 %v150_v54, %v86_v50  ;;  %v148_v8 = vmul.f32 %v144_v59, %v140_v6  ;;  %v428_v5 = vpop.eup %427 }
  0x5d   :  { %390 = vmatpush3.msra.mxu0 %v719_v57  ;;  %v153_v10 = vadd.f32 %v149_v2, %v85_v61  ;;  %v430_v21 = vpop.eup %429  ;;  %v182_v22 = vmul.f32 %v428_v5, %v149_v2  ;;  %v159_v45 = vmul.f32 %v719_v57, %v719_v57  ;;  %v303_v2 = vld [vmem:[%s773_s6] sm:$0x1]  ;;  %s599_s6 = smov [#allocation11]  }
  0x5e   :  { %391 = vmatprep.subr.mxu0 %v597_v0  ;;  %v152_v11 = vadd.f32 %v148_v8, %v84_v4  ;;  %v181_v23 = vmul.f32 %v430_v21, %v148_v8  ;;  %v432_v24 = vpop.eup %431  ;;  %v158_v40 = vmul.f32 %v154_v60, %v154_v60  ;;  %s355_s11 = sshll.u32 %s599_s6, 4  ;;  %s356_s11 = int_to_ptr.vmem [resolvable:$true] %s355_s11 }
  0x5f   :  { %392 = vmatpush3.msra.mxu0 %v154_v60  ;;  %v183_v25 = vmul.f32 %v432_v24, %v150_v54  ;;  %v195_v26 = vmul.f32 %v182_v22, %v182_v22  ;;  %v434_v28 = vpop.eup %433  ;;  %v157_v36 = vmul.f32 %v153_v10, %v153_v10  ;;  %s521_s12 = scalar_lea.vmem %s356_s11, 16  ;;  %s525_s4 = scalar_lea.vmem %s356_s11, 32 }
  0x60   :  { %393 = vmatprep.subr.mxu0 %v597_v0  ;;  %v194_v27 = vmul.f32 %v181_v23, %v181_v23  ;;  %v184_v29 = vmul.f32 %v434_v28, %v151_v49  ;;  %v156_v37 = vmul.f32 %v152_v11, %v152_v11  ;;  %v188_v49 = vrot.slane %v187_v47, 4  ;;  %p522_p6 = scmp.ne.s32.totalorder %s356_s11, %s521_s12  ;;  %p526_p7 = scmp.lt.s32.totalorder %s356_s11, %s356_s11 }
  0x61   :  { %394 = vmatpush3.msra.mxu0 %v153_v10  ;;  %v196_v30 = vmul.f32 %v183_v25, %v183_v25  ;;  %p527_p8 = scmp.lt.s32.totalorder %s525_s4, %s521_s12 }
  0x62   :  { %395 = vmatprep.subr.mxu0 %v597_v0  ;;  %v740_v0 = vld [vmem:[%s772_s5] sm:$0x1]  ;;  %v198_v31 = vadd.f32 %v195_v26, %v194_v27  ;;  %v197_v33 = vmul.f32 %v184_v29, %v184_v29  ;;  %v160_v41 = vadd.f32 %v157_v36, %v156_v37  ;;  %v189_v53 = vadd.f32 %v188_v49, %v187_v47 }
  0x63   :  { %396 = vmatpush3.msra.mxu0 %v152_v11  ;;  %v291_v7 = vmul.f32 1.442695, %v740_v0  ;;  %v317_v39 = vsub.f32 0.0, %v740_v0  ;;  %vm290_vm11 = vcmp.gt.f32.partialorder %v740_v0, 20.0  ;;  %p528_p9 = por %p527_p8, %p526_p7 }
  0x64   :  { %398 = vmatmul.mubr.msk.f32.vlgmr.msra.gmra.mxu0 %vm210_vm9, %v209_v12  ;;  %v199_v34 = vadd.f32 %v198_v31, %v196_v30  ;;  %v161_v46 = vadd.f32 %v160_v41, %v158_v40  ;;  %v190_v61 = vrot.slane %v189_v53, 2 }
  0x65   :  { %435 = vpow2.f32 %v291_v7  ;;  %v318_v42 = vmul.f32 1.442695, %v317_v39  ;;  %p529_p10 = pnand %p528_p9, %p522_p6 }
  0x66   :  { %v200_v38 = vadd.f32 %v199_v34, %v197_v33  ;;  %v162_v51 = vadd.f32 %v161_v46, %v159_v45  ;;  %v191_v1 = vadd.f32 %v190_v61, %v189_v53 }
  0x68   :  { %v201_v43 = vrot.slane %v200_v38, 4  ;;  %v163_v58 = vrot.slane %v162_v51, 4  ;;  %v192_v8 = vrot.slane %v191_v1, 1 }
  0x6a   :  { %v202_v50 = vadd.f32 %v201_v43, %v200_v38  ;;  %v164_v9 = vadd.f32 %v163_v58, %v162_v51  ;;  %v193_v14 = vadd.f32 %v192_v8, %v191_v1 }
  0x6c   :  { %v203_v54 = vrot.slane %v202_v50, 2  ;;  %v165_v4 = vrot.slane %v164_v9, 2 }
  0x6e   :  { %v204_v3 = vadd.f32 %v203_v54, %v202_v50  ;;  %v166_v12 = vadd.f32 %v165_v4, %v164_v9 }
  0x70   :  { %v205_v62 = vrot.slane %v204_v3, 1  ;;  %v167_v18 = vrot.slane %v166_v12, 1 }
  0x72   :  { %v436_v32 = vpop.eup %435  ;;  %v206_v10 = vadd.f32 %v205_v62, %v204_v3  ;;  %v168_v5 = vadd.f32 %v167_v18, %v166_v12 }
  0x73   :  { %v293_v35 = vadd.f32 1.0, %v436_v32  ;;  %v296_v48 = vmul.f32 -0.5, %v436_v32  ;;  %v299_v56 = vand.u32 2147483647, %v436_v32 }
  0x74   :  { %v207_v15 = vmul.f32 0.5, %v206_v10 }
  0x75   :  { %437 = vlog2.f32 %v293_v35  ;;  %v297_v52 = vadd.f32 1.0, %v296_v48  ;;  %vm300_vm10 = vcmp.lt.f32.partialorder %v299_v56, 0.0004427343 }
  0x76   :  { %439 = vpow2.f32 %v318_v42  ;;  %v208_v19 = vadd.f32 %v207_v15, %v193_v14 }
  0x77   :  { %v298_v60 = vmul.f32 %v436_v32, %v297_v52 }
  0x78   :  { %v321_v21 = vadd.f32 %v740_v0, %v208_v19 }
  0x82   :  { %v438_v55 = vpop.eup %437 }
  0x83   :  { %v295_v59 = vmul.f32 0.6931472, %v438_v55  ;;  %v440_v11 = vpop.eup %439 }
  0x85   :  { %v301_v57 = vsel %vm300_vm10, %v298_v60, %v295_v59 }
  0x86   :  { %v302_v63 = vsel %vm290_vm11, %v740_v0, %v301_v57 }
  0x87   :  { %v304_v6 = vmul.f32 %v303_v2, %v302_v63 }
  0x89   :  { %v320_v16 = vmul.f32 %v440_v11, %v304_v6  ;;  %v305_v17 = vadd.f32 %v304_v6, %v288_v13 }
  0x8b   :  { %v322_v20 = vmul.f32 %v320_v16, %v320_v16  ;;  %v314_v7 = vmul.f32 %v305_v17, %v305_v17 }
  0x8d   :  { %v323_v22 = vmul.f32 0.5, %v322_v20  ;;  %v315_v23 = vadd.f32 %v314_v7, %v168_v5 }
  0x8f   :  { %v324_v24 = vadd.f32 %v323_v22, %v321_v21  ;;  %316 = vst [vmem:[#allocation11] sm:$0x1] %v315_v23 }
  0x90   :  { %532 = shalt.err (!%p529_p10)
}
  0x91   :  { %358 = dma.vmem_to_hbm [thread:$0]  %s356_s11, 16, %s775_s8, [#allocation12]   ;;  %325 = vst [vmem:[#allocation13] sm:$0x1] %v324_v24 }
  0x92   :  { %s600_s15 = smov [#allocation13]  }
  0x93   :  { %s365_s16 = sshll.u32 %s600_s15, 4  ;;  %s366_s16 = int_to_ptr.vmem [resolvable:$true] %s365_s16 }
  0x94   :  { %s541_s17 = scalar_lea.vmem %s366_s16, 16  ;;  %s545_s18 = scalar_lea.vmem %s366_s16, 32 }
  0x95   :  { %p542_p11 = scmp.ne.s32.totalorder %s366_s16, %s541_s17  ;;  %p546_p12 = scmp.lt.s32.totalorder %s366_s16, %s366_s16 }
  0x96   :  { %p547_p13 = scmp.lt.s32.totalorder %s545_s18, %s541_s17 }
  0x98   :  { %p548_p0 = por %p547_p13, %p546_p12 }
  0x9a   :  { %p549_p1 = pnand %p548_p0, %p542_p11 }
  0x9c   :  { %552 = shalt.err (!%p549_p1)
}
  0x9d   :  { %368 = dma.vmem_to_hbm [thread:$0]  %s366_s16, 16, %s776_s9, [#allocation12]   ;;  %v307_v0 = vlaneseq }
  0x9e   :  { %s601_s8 = smov [#allocation10]  }
  0x9f   :  { %v308_v25 = vshrl.u32 %v307_v0, 7  ;;  %s345_s21 = sshll.u32 %s601_s8, 4  ;;  %s346_s21 = int_to_ptr.vmem [resolvable:$true] %s345_s21 }
  0xa0   :  { %s561_s22 = scalar_lea.vmem %s346_s21, 128  ;;  %p566_p3 = scmp.lt.s32.totalorder %s346_s21, %s346_s21 }
  0xa1   :  { %v309_v26 = vsub.s32 0, %v308_v25  ;;  %p562_p2 = scmp.ne.s32.totalorder %s346_s21, %s561_s22  ;;  %p567_p4 = scmp.lt.s32.totalorder %s561_s22, %s561_s22 }
  0xa3   :  { %v310_v27 = vrot.slane %v305_v17, %v309_v26  ;;  %p568_p5 = por %p567_p4, %p566_p3 }
  0xa5   :  { %p569_p6 = pnand %p568_p5, %p562_p2 }
 0x124   :  { %v280_v28 = vpop.f32.mrf.mxu0 }
 0x125   :  { %v312_v29 = vadd.f32 %v310_v27, %v280_v28 }
 0x126   :  { %v399_v30 = vpop.f32.mrf.mxu0 }
 0x127   :  { %313 = vst [vmem:[#allocation10] sm:$0xff] %v312_v29 }
 0x128   :  { %572 = shalt.err (!%p569_p6)
}
 0x129   :  { %348 = dma.vmem_to_hbm [thread:$0]  %s346_s21, 128, %s774_s7, [#allocation4]  }
 0x12a   :  { %587 = dma.done.wait [#allocation4], 128  }
 0x12b   :  { %588 = vsyncadd [#allocation4], 4294967168 }
 0x12c   :  { %589 = dma.done.wait [#allocation12], 32  }
 0x12d   :  { %590 = vsyncadd [#allocation12], 4294967264 }
 0x12e   :  { %378 = vsyncpa [#allocation3], 1 }
 0x12f   :  { %379 = vsyncpa [#allocation6], 1 }
 0x130   :  { %380 = vsyncpa [#allocation9], 1 }
 0x131   :  { %381 = vsyncpa [#allocation4], 1 }
 0x132   :  { %382 = vsyncpa [#allocation12], 1 }

</bundles_post_ra>
